<compile_context>
chip_gen: v7x
topology: tpu7x:2x2x1
jax: 0.10.0
libtpu: 0.0.40
codegen_flags: <defaults>
</compile_context>

<pallas_src>
import functools

import jax
import jax.numpy as jnp
from jax import lax
from jax.experimental import pallas as pl
from jax.experimental.pallas import tpu as pltpu


def _conv_stats_kernel(p_ref, w_ref, y_ref, sum_ref, ssq_ref):
    """7x7/stride-2 conv as ONE MXU dot per tile + f32 partial channel stats.

    p_ref  : (1, TM, Kpad)  bf16  im2col rows (one tile of output pixels)
    w_ref  : (Kpad, Cpad)   bf16  packed filter, channels zero-padded to 128
    y_ref  : (1, TM, Cpad)  bf16  conv output tile (lane-dense, unmasked store)
    sum_ref: (1, 1, Cpad)   f32   per-tile channel sum
    ssq_ref: (1, 1, Cpad)   f32   per-tile channel sum of squares
    """
    acc = jnp.dot(p_ref[0], w_ref[...], preferred_element_type=jnp.float32)
    y_ref[0] = acc.astype(y_ref.dtype)
    sum_ref[0] = jnp.sum(acc, axis=0, keepdims=True)
    ssq_ref[0] = jnp.sum(acc * acc, axis=0, keepdims=True)


def _bn_relu_pool_kernel(y_ref, scale_ref, shift_ref, o_ref, *, Ho, Pho, Pwo, Cpad):
    """Fused BN affine + ReLU + 3x3/stride-2 max-pool (pad 1) on one image.

    y_ref : (1, Ho*2, Pwo, Cpad) bf16  conv output; row index = h*2 + (w parity)
    scale/shift : (1, Cpad) f32        per-channel BN scale / shift
    o_ref : (1, Pho, Pwo, Cpad) f32    pooled output (one dense store)
    """
    sc = scale_ref[...]                              # (1, Cpad)
    sh = shift_ref[...]
    yb = y_ref[0].reshape(Ho, 2, Pwo, Cpad)          # free: splits leading dim only
    # BN affine + ReLU on the even-w and odd-w column planes.
    even = jnp.maximum(yb[:, 0].astype(jnp.float32) * sc + sh, 0.0)   # (Ho, Pwo, C)
    odd = jnp.maximum(yb[:, 1].astype(jnp.float32) * sc + sh, 0.0)    # (Ho, Pwo, C)
    # Width direction: output col j pools input cols {2j-1, 2j, 2j+1}
    #   = {odd[j-1] (zero-pad at j=0), even[j], odd[j]}.
    # Zero padding is exact because ReLU already ran (all values >= 0).
    prev_w = jnp.concatenate(
        [jnp.zeros((Ho, 1, Cpad), jnp.float32), odd[:, :Pwo - 1, :]], axis=1)
    wmax = jnp.maximum(jnp.maximum(even, odd), prev_w)                # (Ho, Pwo, C)
    # Height direction: output row i pools input rows {2i-1, 2i, 2i+1}.
    w2 = wmax.reshape(Pho, 2, Pwo, Cpad)             # free: splits leading dim only
    even_h = w2[:, 0]
    odd_h = w2[:, 1]
    prev_h = jnp.concatenate(
        [jnp.zeros((1, Pwo, Cpad), jnp.float32), odd_h[:Pho - 1]], axis=0)
    o_ref[0] = jnp.maximum(jnp.maximum(even_h, odd_h), prev_h)        # one dense store


def _pick_row_tile(n_rows):
    for tm in (512, 256, 128, 64, 32, 16, 8):
        if n_rows % tm == 0:
            return tm
    return n_rows          # fallback: full extent is always a legal block


def res_stem_in_forward(x_nchw, w_oihw, gamma, beta, eps=1e-5):
    """ResStemIN forward (training-mode BN statistics). NCHW in / NCHW out."""
    N, Cin, H, W = x_nchw.shape
    Cout = w_oihw.shape[0]
    assert H % 4 == 0 and W % 4 == 0, "stem expects H, W divisible by 4"
    Ho, Wo = H // 2, W // 2                       # 7x7 / stride-2 / pad-3 conv
    Pho, Pwo = Ho // 2, Wo // 2                   # 3x3 / stride-2 / pad-1 pool
    HW = Ho * Wo
    K = 49 * Cin
    Kpad = ((K + 7) // 8) * 8                     # sublane-align the contraction dim
    Cpad = ((max(Cout, 128) + 127) // 128) * 128  # lane-dense channel dim (>= 128)

    # ---- host glue (pure layout work, no FLOPs) ---------------------------------
    # NCHW -> NHWC bf16, pad 3, im2col so the conv is one large-K MXU dot per tile.
    x = jnp.transpose(x_nchw, (0, 2, 3, 1)).astype(jnp.bfloat16)
    xp = jnp.pad(x, ((0, 0), (3, 3), (3, 3), (0, 0)))
    cols = []
    for kh in range(7):
        for kw in range(7):
            cols.append(xp[:, kh:kh + 2 * Ho:2, kw:kw + 2 * Wo:2, :])
    pat = jnp.stack(cols, axis=3).reshape(N, Ho, Wo, K)   # feature order (kh, kw, cin)
    # Reorder pixels within each output row as (even-w ..., odd-w ...) so the pool
    # kernel splits the width parity with a cheap leading-dim index (no strided reads).
    pat = pat.reshape(N, Ho, Pwo, 2, K).transpose(0, 1, 3, 2, 4).reshape(N, HW, K)
    pat = jnp.pad(pat, ((0, 0), (0, 0), (0, Kpad - K)))

    wk = jnp.transpose(w_oihw, (2, 3, 1, 0)).reshape(K, Cout).astype(jnp.bfloat16)
    wk = jnp.pad(wk, ((0, Kpad - K), (0, Cpad - Cout)))   # zero-pad K and channels

    TM = _pick_row_tile(HW)
    T = HW // TM

    # ---- kernel 1: conv (single dot per tile) + per-tile f32 channel stats ------
    y, sums, ssqs = pl.pallas_call(
        _conv_stats_kernel,
        out_shape=(
            jax.ShapeDtypeStruct((N, HW, Cpad), jnp.bfloat16),
            jax.ShapeDtypeStruct((N * T, 1, Cpad), jnp.float32),
            jax.ShapeDtypeStruct((N * T, 1, Cpad), jnp.float32),
        ),
        grid=(N, T),
        in_specs=[
            pl.BlockSpec((1, TM, Kpad), lambda n, t: (n, t, 0)),
            pl.BlockSpec((Kpad, Cpad), lambda n, t: (0, 0)),
        ],
        out_specs=(
            pl.BlockSpec((1, TM, Cpad), lambda n, t: (n, t, 0)),
            pl.BlockSpec((1, 1, Cpad), lambda n, t: (n * T + t, 0, 0)),
            pl.BlockSpec((1, 1, Cpad), lambda n, t: (n * T + t, 0, 0)),
        ),
        compiler_params=pltpu.CompilerParams(
            dimension_semantics=("parallel", "parallel"),
            vmem_limit_bytes=32 * 1024 * 1024),
    )(pat, wk)

    # ---- tiny host reduction: batch stats -> BN scale / shift -------------------
    cnt = float(N * HW)
    mean = jnp.sum(sums, axis=(0, 1)) / cnt                              # (Cpad,)
    var = jnp.maximum(jnp.sum(ssqs, axis=(0, 1)) / cnt - mean * mean, 0.0)
    gamma_p = jnp.pad(gamma.astype(jnp.float32), (0, Cpad - Cout))
    beta_p = jnp.pad(beta.astype(jnp.float32), (0, Cpad - Cout))
    inv = lax.rsqrt(var + eps)
    scale = (gamma_p * inv).reshape(1, Cpad)
    shift = (beta_p - mean * gamma_p * inv).reshape(1, Cpad)
    # NOTE: the BN affine is applied to the bf16-rounded conv output in kernel 2
    # while mean/var come from the f32 accumulator; the mismatch is ~bf16 eps.

    # ---- kernel 2: fused BN affine + ReLU + 3x3/2 max-pool ----------------------
    y4 = y.reshape(N, Ho * 2, Pwo, Cpad)       # free host reshape (same HBM layout)
    out = pl.pallas_call(
        functools.partial(_bn_relu_pool_kernel, Ho=Ho, Pho=Pho, Pwo=Pwo, Cpad=Cpad),
        out_shape=jax.ShapeDtypeStruct((N, Pho, Pwo, Cpad), jnp.float32),
        grid=(N,),
        in_specs=[
            pl.BlockSpec((1, Ho * 2, Pwo, Cpad), lambda n: (n, 0, 0, 0)),
            pl.BlockSpec((1, Cpad), lambda n: (0, 0)),
            pl.BlockSpec((1, Cpad), lambda n: (0, 0)),
        ],
        out_specs=pl.BlockSpec((1, Pho, Pwo, Cpad), lambda n: (n, 0, 0, 0)),
        compiler_params=pltpu.CompilerParams(
            dimension_semantics=("parallel",),
            vmem_limit_bytes=32 * 1024 * 1024),
    )(y4, scale, shift)

    # strip the channel padding (free slice), NHWC -> NCHW
    return jnp.transpose(out[..., :Cout], (0, 3, 1, 2))


# ------------------------- pure-JAX reference -------------------------
def _ref_forward(x_nchw, w_oihw, gamma, beta, eps=1e-5):
    # Matches the kernel's numerics: bf16 conv inputs, f32 accumulation.
    x = jnp.transpose(x_nchw, (0, 2, 3, 1)).astype(jnp.bfloat16)
    w = jnp.transpose(w_oihw, (2, 3, 1, 0)).astype(jnp.bfloat16)
    y = lax.conv_general_dilated(
        x, w, window_strides=(2, 2), padding=((3, 3), (3, 3)),
        dimension_numbers=("NHWC", "HWIO", "NHWC"),
        preferred_element_type=jnp.float32)
    mean = jnp.mean(y, axis=(0, 1, 2))
    var = jnp.mean((y - mean) ** 2, axis=(0, 1, 2))
    y = (y - mean) * lax.rsqrt(var + eps) * gamma + beta
    y = jnp.maximum(y, 0.0)
    p = lax.reduce_window(y, -jnp.inf, lax.max,
                          window_dimensions=(1, 3, 3, 1),
                          window_strides=(1, 2, 2, 1),
                          padding=((0, 0), (1, 1), (1, 1), (0, 0)))
    return jnp.transpose(p, (0, 3, 1, 2))


if __name__ == "__main__":
    key = jax.random.PRNGKey(0)
    N, w_in, w_out, H, W = 2, 3, 8, 32, 32

    k1, k2, k3, k4 = jax.random.split(key, 4)
    x = jax.random.normal(k1, (N, w_in, H, W), jnp.float32)
    conv_w = (jax.random.normal(k2, (w_out, w_in, 7, 7), jnp.float32)
              * (2.0 / (49 * w_in)) ** 0.5)
    gamma = jax.random.uniform(k3, (w_out,), jnp.float32, 0.5, 1.5)
    beta = jax.random.normal(k4, (w_out,), jnp.float32) * 0.1

    out = res_stem_in_forward(x, conv_w, gamma, beta)
    out = jax.block_until_ready(out)

    ref = _ref_forward(x, conv_w, gamma, beta)
    assert out.shape == (N, w_out, H // 4, W // 4), out.shape
    err = float(jnp.max(jnp.abs(out - ref)))
    assert jnp.allclose(out, ref, atol=2e-2, rtol=2e-2), err

    print("KERNEL_OK")
</pallas_src>

<mosaic_0001>
module attributes {stable_mosaic.version = 11 : i64} {
  func.func @_conv_stats_kernel(%arg0: i32, %arg1: i32, %arg2: memref<1x256x152xbf16, #tpu.memory_space<vmem>>, %arg3: memref<152x128xbf16, #tpu.memory_space<vmem>>, %arg4: memref<1x256x128xbf16, #tpu.memory_space<vmem>>, %arg5: memref<1x1x128xf32, #tpu.memory_space<vmem>>, %arg6: memref<1x1x128xf32, #tpu.memory_space<vmem>>) attributes {dimension_semantics = [#tpu.dimension_semantics<parallel>, #tpu.dimension_semantics<parallel>], iteration_bounds = array<i64: 2, 1>, scalar_prefetch = 0 : i64, scratch_operands = 0 : i64, tpu.core_type = #tpu.core_type<tc>, window_params = [{transform_indices = @transform_0, window_bounds = array<i64: 1, 256, 152>}, {pipeline_mode = #tpu.pipeline_mode<synchronous>, transform_indices = @transform_1, window_bounds = array<i64: 152, 128>}, {transform_indices = @transform_2, window_bounds = array<i64: 1, 256, 128>}, {transform_indices = @transform_3, window_bounds = array<i64: 1, 1, 128>}, {transform_indices = @transform_4, window_bounds = array<i64: 1, 1, 128>}]} {
    %c0 = arith.constant 0 : index
    %c0_0 = arith.constant 0 : index
    %c0_1 = arith.constant 0 : index
    %0 = vector.load %arg2[%c0, %c0_0, %c0_1] : memref<1x256x152xbf16, #tpu.memory_space<vmem>>, vector<1x256x152xbf16>
    %1 = vector.shape_cast %0 : vector<1x256x152xbf16> to vector<256x152xbf16>
    %c0_2 = arith.constant 0 : index
    %c0_3 = arith.constant 0 : index
    %2 = vector.load %arg3[%c0_2, %c0_3] : memref<152x128xbf16, #tpu.memory_space<vmem>>, vector<152x128xbf16>
    %cst = arith.constant dense<0.000000e+00> : vector<256x128xf32>
    %3 = tpu.matmul %1, %2, %cst {dimension_numbers = #tpu.dot_dimension_numbers<[1], [0], [0], [1], [0, 0, 1, 1], [], []>} : vector<256x152xbf16>, vector<152x128xbf16>, vector<256x128xf32> -> vector<256x128xf32>
    %4 = arith.truncf %3 : vector<256x128xf32> to vector<256x128xbf16>
    %c0_4 = arith.constant 0 : index
    %c0_5 = arith.constant 0 : index
    %c0_6 = arith.constant 0 : index
    %5 = vector.load %arg4[%c0_4, %c0_5, %c0_6] : memref<1x256x128xbf16, #tpu.memory_space<vmem>>, vector<1x256x128xbf16>
    %6 = vector.shape_cast %5 : vector<1x256x128xbf16> to vector<256x128xbf16>
    %7 = vector.shape_cast %4 : vector<256x128xbf16> to vector<1x256x128xbf16>
    tpu.vector_store %arg4[%c0_4, %c0_5, %c0_6], %7 {strides = array<i32>} : memref<1x256x128xbf16, #tpu.memory_space<vmem>>, vector<1x256x128xbf16>,
    %cst_7 = arith.constant dense<0.000000e+00> : vector<128xf32>
    %8 = vector.multi_reduction <add>, %3, %cst_7 [0] : vector<256x128xf32> to vector<128xf32>
    %9 = vector.shape_cast %8 : vector<128xf32> to vector<1x128xf32>
    %c0_8 = arith.constant 0 : index
    %c0_9 = arith.constant 0 : index
    %c0_10 = arith.constant 0 : index
    %10 = vector.load %arg5[%c0_8, %c0_9, %c0_10] : memref<1x1x128xf32, #tpu.memory_space<vmem>>, vector<1x1x128xf32>
    %11 = vector.shape_cast %10 : vector<1x1x128xf32> to vector<1x128xf32>
    %12 = vector.shape_cast %9 : vector<1x128xf32> to vector<1x1x128xf32>
    tpu.vector_store %arg5[%c0_8, %c0_9, %c0_10], %12 {strides = array<i32>} : memref<1x1x128xf32, #tpu.memory_space<vmem>>, vector<1x1x128xf32>,
    %13 = arith.mulf %3, %3 : vector<256x128xf32>
    %cst_11 = arith.constant dense<0.000000e+00> : vector<128xf32>
    %14 = vector.multi_reduction <add>, %13, %cst_11 [0] : vector<256x128xf32> to vector<128xf32>
    %15 = vector.shape_cast %14 : vector<128xf32> to vector<1x128xf32>
    %c0_12 = arith.constant 0 : index
    %c0_13 = arith.constant 0 : index
    %c0_14 = arith.constant 0 : index
    %16 = vector.load %arg6[%c0_12, %c0_13, %c0_14] : memref<1x1x128xf32, #tpu.memory_space<vmem>>, vector<1x1x128xf32>
    %17 = vector.shape_cast %16 : vector<1x1x128xf32> to vector<1x128xf32>
    %18 = vector.shape_cast %15 : vector<1x128xf32> to vector<1x1x128xf32>
    tpu.vector_store %arg6[%c0_12, %c0_13, %c0_14], %18 {strides = array<i32>} : memref<1x1x128xf32, #tpu.memory_space<vmem>>, vector<1x1x128xf32>,
    return
  }
  func.func @transform_0(%arg0: i32, %arg1: i32) -> (i32, i32, i32) {
    %c0_i32 = arith.constant 0 : i32
    %c0_i32_0 = arith.constant 0 : i32
    return %arg0, %arg1, %c0_i32 : i32, i32, i32
  }
  func.func @transform_1(%arg0: i32, %arg1: i32) -> (i32, i32) {
    %c0_i32 = arith.constant 0 : i32
    %c0_i32_0 = arith.constant 0 : i32
    %c0_i32_1 = arith.constant 0 : i32
    return %c0_i32, %c0_i32_0 : i32, i32
  }
  func.func @transform_2(%arg0: i32, %arg1: i32) -> (i32, i32, i32) {
    %c0_i32 = arith.constant 0 : i32
    %c0_i32_0 = arith.constant 0 : i32
    return %arg0, %arg1, %c0_i32 : i32, i32, i32
  }
  func.func @transform_3(%arg0: i32, %arg1: i32) -> (i32, i32, i32) {
    %c1_i32 = arith.constant 1 : i32
    %0 = arith.muli %arg0, %c1_i32 : i32
    %1 = arith.addi %0, %arg1 : i32
    %c0_i32 = arith.constant 0 : i32
    %c0_i32_0 = arith.constant 0 : i32
    %c0_i32_1 = arith.constant 0 : i32
    return %1, %c0_i32, %c0_i32_0 : i32, i32, i32
  }
  func.func @transform_4(%arg0: i32, %arg1: i32) -> (i32, i32, i32) {
    %c1_i32 = arith.constant 1 : i32
    %0 = arith.muli %arg0, %c1_i32 : i32
    %1 = arith.addi %0, %arg1 : i32
    %c0_i32 = arith.constant 0 : i32
    %c0_i32_0 = arith.constant 0 : i32
    %c0_i32_1 = arith.constant 0 : i32
    return %1, %c0_i32, %c0_i32_0 : i32, i32, i32
  }
}

</mosaic_0001>

<bundles_post_ra>
// kernel: tpu_custom_call.1
= control target key start
LH: loop header
LB: loop body
LE: loop exit
PB: predicated region body
PF: predicated region fallthrough
CT: control target
= control target key end

     0   :  { %10 = vsyncpa [#allocation3], 0  ;;  %s2118_s0 = inlined_call_operand.vmem [shape: bf16[2,256,152], index: 0, kind: input, shape index: {}]   ;;  %s2119_s1 = inlined_call_operand.vmem [shape: bf16[152,128], index: 1, kind: input, shape index: {}]   ;;  %s2120_s2 = inlined_call_operand.hbm [shape: bf16[2,256,128], index: 2, kind: output, shape index: {0}]   ;;  %s2121_s3 = inlined_call_operand.hbm [shape: f32[2,1,128], index: 3, kind: output, shape index: {1}]   ;;  %s2122_s4 = inlined_call_operand.hbm [shape: f32[2,1,128], index: 4, kind: output, shape index: {2}]  }
   0x1   :  { %12 = vsyncpa [#allocation3 + $0x1], 0 }
   0x2   :  { %13 = vsyncpa [#allocation5], 0 }
   0x3   :  { %15 = vsyncpa [#allocation5 + $0x1], 0  ;;  %s1727_s15 = smov 0   ;;  %s1729_s16 = smov 0  }
   0x4   :  { %s1731_s17 = smov 0   ;;  %s1733_s18 = smov 0  }
   0x5   :  { %s1735_s19 = smov 0   ;;  %s1737_s20 = smov 0  }
   0x6 LB: > { %s1176_s21 = sadd.s32 4294967295, %s1694_s20   ;;  %s1177_s22 = sadd.s32 4294967294, %s1694_s20   ;;  %s1694_s20 = sphi %s1737_s20, %s21_s20   ;;  %s1690_s19 = sphi %s1735_s19, %s2129_s19   ;;  %s1686_s18 = sphi %s1733_s18, %s2128_s18   ;;  %s1682_s17 = sphi %s1731_s17, %s2127_s17   ;;  %s1678_s16 = sphi %s1729_s16, %s2126_s16   ;;  %s1674_s15 = sphi %s1727_s15, %s2125_s15  }
   0x7   : > { %s33_s23 = sadd.s32 1, %s1690_s19  ;;  %s91_s24 = sadd.s32 1, %s1682_s17 }
   0x8   : > { %p35_p0 = scmp.ge.s32.totalorder %s33_s23, 2  ;;  %p101_p1 = scmp.ne.s32.totalorder %s1682_s17, %s1678_s16 }
   0x9   : > { %p102_p2 = scmp.eq.s32.totalorder %s1176_s21, 1  ;;  %p107_p3 = scmp.ne.s32.totalorder %s1678_s16, %s1674_s15 }
   0xa   : > { %s2131_s23 = smov (%p35_p0, %s33_s23), 0  ;;  %p108_p5 = scmp.eq.s32.totalorder %s1177_s22, 1 }
   0xb   : > { %p1769_p4 = por %p102_p2, %p101_p1  ;;  %s86_s26 = ssub.s32 %s1690_s19, %s2131_s23 }
   0xc   : > { %p1180_p6 = scmp.ge.s32.totalorder %s1694_s20, 1  ;;  %p89_p7 = scmp.eq.s32.totalorder %s86_s26, 0 }
   0xd   : > { %p1778_p8 = por %p108_p5, %p107_p3  ;;  %p199_p9 = scmp.lt.s32.totalorder %s1694_s20, 3 }
   0xe   : > { %s1784_s28 = scalar_select %p89_p7, %s1682_s17, %s91_s24  }
   0xf   : > { %p200_p10 = pnand %p1180_p6, %p199_p9 }
  0x10   : > { %v1498_v0 = vld [vmem:[%s2119_s1] sm:$0xff] (!%p200_p10)   ;;  %v1696_v1 = vmov (!%p200_p10), 0   ;;  %v1499_v2 = vld [vmem:[%s2119_s1 + $0x8] sm:$0xff] (!%p200_p10)   ;;  %p239_p11 = scmp.lt.s32.totalorder (!%p200_p10), %s1686_s18, 1  ;;  %v1500_v3 = vld [vmem:[%s2119_s1 + $0x10] sm:$0xff] (!%p200_p10)   ;;  %vm505_vm0 = vcmask (!%p200_p10), 195584  }
  0x11   : > { %203 = sbr.rel (%p200_p10) target bundleno = 420 (0x1a4), region = 28  ;;  %558 = vmatprep.subr.bf16.mxu0 (!%p200_p10), %v1696_v1  ;;  %1410 = vmatprep.subr.bf16.mxu1 (!%p200_p10), %v1696_v1  ;;  %v1501_v4 = vld [vmem:[%s2119_s1 + $0x18] sm:$0xff] (!%p200_p10)   ;;  %v1502_v6 = vld [vmem:[%s2119_s1 + $0x20] sm:$0xff] (!%p200_p10)   ;;  %v1503_v8 = vld [vmem:[%s2119_s1 + $0x28] sm:$0xff] (!%p200_p10)   ;;  %vm554_vm1 = vcmask (!%p200_p10), 1043456   ;;  %s1872_s24 = sand.u32 (!%p200_p10), 1, %s1678_s16  }
  0x12   : > { %559 = vmatpush1.bf16.msra.mxu0 (!%p200_p10), %v1498_v0  ;;  %1420 = vmatpush1.bf16.msra.mxu1 (!%p200_p10), %v1498_v0  ;;  %v1504_v9 = vld [vmem:[%s2119_s1 + $0x30] sm:$0xff] (!%p200_p10)   ;;  %v1505_v10 = vld [vmem:[%s2119_s1 + $0x38] sm:$0xff] (!%p200_p10)   ;;  %v1506_v11 = vld [vmem:[%s2119_s1 + $0x40] sm:$0xff] (!%p200_p10)   ;;  %s1181_s26 = sshll.u32 (!%p200_p10), %s1872_s24, 7  ;;  %s1314_s29 = sshll.u32 (!%p200_p10), %s1686_s18, 11 }
  0x13   : > { %560 = vmatprep.subr.bf16.mxu0 (!%p200_p10), %v1696_v1  ;;  %1411 = vmatprep.subr.bf16.mxu1 (!%p200_p10), %v1696_v1  ;;  %v1507_v12 = vld [vmem:[%s2119_s1 + $0x48] ss:$0 sps:$4 sm:$0xff] (!%p200_p10)   ;;  %s988_s8 = scalar_lea.sflag (!%p200_p10), [#allocation3], %s1872_s24 }
  0x14   : > { %v556_v13 = vsel (!%p200_p10), %vm554_vm1, %v1507_v12, 0 }
  0x16   : > { %561 = vmatpush1.bf16.msra.mxu0 (!%p200_p10), %v1499_v2  ;;  %1421 = vmatpush1.bf16.msra.mxu1 (!%p200_p10), %v1499_v2 }
  0x17   : > { %562 = vmatprep.subr.bf16.mxu0 (!%p200_p10), %v1696_v1  ;;  %1412 = vmatprep.subr.bf16.mxu1 (!%p200_p10), %v1696_v1 }
  0x18   : > { %s240_s7 = scalar_select %p239_p11, %s1686_s18, 1 }
  0x1a   : > { %s1281_s10 = sshll.u32 %s240_s7, 8  ;;  %563 = vmatpush1.bf16.msra.mxu0 %v1500_v3  ;;  %1422 = vmatpush1.bf16.msra.mxu1 %v1500_v3  ;;  %s1942_s7 = scalar_lea.hbm %s2120_s2, %s1314_s29 }
  0x1b   : > { %s1800_s13 = scalar_lea.vmem %s2118_s0, %s1281_s10  ;;  %564 = vmatprep.subr.bf16.mxu0 %v1696_v1  ;;  %1413 = vmatprep.subr.bf16.mxu1 %v1696_v1  ;;  %s1697_s10 = smov [#allocation2]  }
  0x1c   : > { %v1510_v5 = vld [vmem:[%s1800_s13 + $0x4] ss:$8 sps:$4 sm:$0xff]   ;;  %v1508_v14 = vld [vmem:[%s1800_s13] ss:$8 sps:$4 sm:$0xff]   ;;  %v1511_v16 = vld [vmem:[%s1800_s13 + $0x14] ss:$8 sps:$4 sm:$0xff]  }
  0x1d   : > { %1226 = vmatprep.mubr.msk.bf16.mxu0 %vm505_vm0, %v1510_v5  ;;  %v1522_v7 = vld [vmem:[%s1800_s13 + $0x84] ss:$8 sps:$4 sm:$0xff]   ;;  %v1520_v15 = vld [vmem:[%s1800_s13 + $0x80] ss:$8 sps:$4 sm:$0xff]   ;;  %v1526_v17 = vld [vmem:[%s1800_s13 + $0x94] ss:$8 sps:$4 sm:$0xff]  }
  0x1e   : > { %565 = vmatpush1.bf16.msra.mxu0 %v1501_v4  ;;  %1423 = vmatpush1.bf16.msra.mxu1 %v1501_v4  ;;  %v1513_v18 = vld [vmem:[%s1800_s13 + $0x10] ss:$8 sps:$4 sm:$0xff]   ;;  %v1514_v20 = vld [vmem:[%s1800_s13 + $0x24] ss:$8 sps:$4 sm:$0xff]   ;;  %v1516_v22 = vld [vmem:[%s1800_s13 + $0x20] ss:$8 sps:$4 sm:$0xff]  }
  0x1f   : > { %566 = vmatprep.subr.bf16.mxu0 %v1696_v1  ;;  %1414 = vmatprep.subr.bf16.mxu1 %v1696_v1  ;;  %v1528_v19 = vld [vmem:[%s1800_s13 + $0x90] ss:$8 sps:$4 sm:$0xff]   ;;  %v1532_v21 = vld [vmem:[%s1800_s13 + $0xa4] ss:$8 sps:$4 sm:$0xff]   ;;  %v1534_v23 = vld [vmem:[%s1800_s13 + $0xa0] ss:$8 sps:$4 sm:$0xff]  }
  0x20   : > { %1234 = vmatprep.mubr.msk.bf16.mxu1 %vm505_vm0, %v1522_v7  ;;  %v1517_v24 = vld [vmem:[%s1800_s13 + $0x34] ss:$8 sps:$4 sm:$0xff]   ;;  %v1519_v26 = vld [vmem:[%s1800_s13 + $0x30] ss:$8 sps:$4 sm:$0xff]   ;;  %v1523_v28 = vld [vmem:[%s1800_s13 + $0x44] ss:$8 sps:$4 sm:$0xff]  }
  0x21   : > { %v1538_v25 = vld [vmem:[%s1800_s13 + $0xb4] ss:$8 sps:$4 sm:$0xff]   ;;  %v1540_v27 = vld [vmem:[%s1800_s13 + $0xb0] ss:$8 sps:$4 sm:$0xff]   ;;  %v1544_v29 = vld [vmem:[%s1800_s13 + $0xc4] ss:$8 sps:$4 sm:$0xff]  }
  0x22   : > { %567 = vmatpush1.bf16.msra.mxu0 %v1502_v6  ;;  %1424 = vmatpush1.bf16.msra.mxu1 %v1502_v6  ;;  %v1525_v30 = vld [vmem:[%s1800_s13 + $0x40] ss:$8 sps:$4 sm:$0xff]   ;;  %v1529_v32 = vld [vmem:[%s1800_s13 + $0x54] ss:$8 sps:$4 sm:$0xff]   ;;  %v1531_v34 = vld [vmem:[%s1800_s13 + $0x50] ss:$8 sps:$4 sm:$0xff]  }
  0x23   : > { %568 = vmatprep.subr.bf16.mxu0 %v1696_v1  ;;  %1415 = vmatprep.subr.bf16.mxu1 %v1696_v1  ;;  %v1546_v31 = vld [vmem:[%s1800_s13 + $0xc0] ss:$8 sps:$4 sm:$0xff]   ;;  %v1547_v33 = vld [vmem:[%s1800_s13 + $0xd4] ss:$8 sps:$4 sm:$0xff]   ;;  %v1549_v35 = vld [vmem:[%s1800_s13 + $0xd0] ss:$8 sps:$4 sm:$0xff]  }
  0x24   : > { %v1535_v36 = vld [vmem:[%s1800_s13 + $0x64] ss:$8 sps:$4 sm:$0xff]   ;;  %v1537_v38 = vld [vmem:[%s1800_s13 + $0x60] ss:$8 sps:$4 sm:$0xff]   ;;  %v1541_v40 = vld [vmem:[%s1800_s13 + $0x74] ss:$8 sps:$4 sm:$0xff]  }
  0x25   : > { %v1550_v37 = vld [vmem:[%s1800_s13 + $0xe4] ss:$8 sps:$4 sm:$0xff]   ;;  %v1552_v39 = vld [vmem:[%s1800_s13 + $0xe0] ss:$8 sps:$4 sm:$0xff]   ;;  %v1553_v41 = vld [vmem:[%s1800_s13 + $0xf4] ss:$8 sps:$4 sm:$0xff]  }
  0x26   : > { %569 = vmatpush1.bf16.msra.mxu0 %v1503_v8  ;;  %1425 = vmatpush1.bf16.msra.mxu1 %v1503_v8  ;;  %v1543_v42 = vld [vmem:[%s1800_s13 + $0x70] ss:$8 sps:$4 sm:$0xff]   ;;  %s1560_s11 = sshll.u32 %s1697_s10, 4  ;;  %s1561_s11 = int_to_ptr.vmem [resolvable:$false] %s1560_s11 }
  0x27   : > { %570 = vmatprep.subr.bf16.mxu0 %v1696_v1  ;;  %1416 = vmatprep.subr.bf16.mxu1 %v1696_v1  ;;  %v1555_v43 = vld [vmem:[%s1800_s13 + $0xf0] ss:$8 sps:$4 sm:$0xff]   ;;  %s1881_s13 = scalar_lea.vmem [#allocation2], %s1181_s26  ;;  %s1562_s12 = scalar_lea.vmem %s1561_s11, 4096 }
  0x28   : > { %s1011_s30 = sshll.u32 %s1881_s13, 4  ;;  %s1944_s30 = int_to_ptr.vmem [resolvable:$true] %s1011_s30 }
  0x29   : > { %s1556_s9 = scalar_lea.vmem %s1944_s30, 2048  ;;  %p1563_p1 = scmp.lt.s32.totalorder %s1944_s30, %s1561_s11 }
  0x2a   : > { %571 = vmatpush1.bf16.msra.mxu0 %v1504_v9  ;;  %1426 = vmatpush1.bf16.msra.mxu1 %v1504_v9  ;;  %p1557_p12 = scmp.ne.s32.totalorder %s1944_s30, %s1556_s9  ;;  %p1564_p2 = scmp.lt.s32.totalorder %s1562_s12, %s1556_s9 }
  0x2b   : > { %572 = vmatprep.subr.bf16.mxu0 %v1696_v1  ;;  %1417 = vmatprep.subr.bf16.mxu1 %v1696_v1 }
  0x2c   : > { %p1558_p13 = pnand %p1557_p12, %p1769_p4  ;;  %p1565_p3 = por %p1564_p2, %p1563_p1 }
  0x2e   : > { %573 = vmatpush1.bf16.msra.mxu0 %v1505_v10  ;;  %1427 = vmatpush1.bf16.msra.mxu1 %v1505_v10  ;;  %p1559_p0 = pneg %p1558_p13 }
  0x2f   : > { %574 = vmatprep.subr.bf16.mxu0 %v1696_v1  ;;  %1418 = vmatprep.subr.bf16.mxu1 %v1696_v1 }
  0x30   : > { %p1566_p5 = pnand %p1565_p3, %p1559_p0 }
  0x32   : > { %575 = vmatpush1.bf16.msra.mxu0 %v1506_v11  ;;  %1428 = vmatpush1.bf16.msra.mxu1 %v1506_v11 }
  0x33   : > { %576 = vmatprep.subr.bf16.mxu0 %v1696_v1  ;;  %1419 = vmatprep.subr.bf16.mxu1 %v1696_v1 }
  0x36   : > { %577 = vmatpush1.bf16.msra.mxu0 %v556_v13  ;;  %1429 = vmatpush1.bf16.msra.mxu1 %v556_v13 }
  0x39   : > { %591 = vmatmul.mubr.bf16.vlgmr.msra.gmra.mrb[0].mxu0 %v1508_v14  ;;  %655 = vmatmul.mubr.bf16.vlgmr.msra.gmra.mrb[0].mxu1 %v1520_v15 }
  0x3a   : > { %1227 = vmatprep.mubr.msk.bf16.mxu0 %vm505_vm0, %v1511_v16  ;;  %1235 = vmatprep.mubr.msk.bf16.mxu1 %vm505_vm0, %v1526_v17 }
  0x41   : > { %599 = vmatmul.mubr.bf16.gmra.mrb[4].mxu0 %v1513_v18  ;;  %663 = vmatmul.mubr.bf16.gmra.mrb[4].mxu1 %v1528_v19 }
  0x42   : > { %1228 = vmatprep.mubr.msk.bf16.mxu0 %vm505_vm0, %v1514_v20  ;;  %1236 = vmatprep.mubr.msk.bf16.mxu1 %vm505_vm0, %v1532_v21 }
  0x49   : > { %607 = vmatmul.mubr.bf16.gmra.mrb[8].mxu0 %v1516_v22  ;;  %671 = vmatmul.mubr.bf16.gmra.mrb[8].mxu1 %v1534_v23 }
  0x4a   : > { %1229 = vmatprep.mubr.msk.bf16.mxu0 %vm505_vm0, %v1517_v24  ;;  %1237 = vmatprep.mubr.msk.bf16.mxu1 %vm505_vm0, %v1538_v25 }
  0x51   : > { %615 = vmatmul.mubr.bf16.gmra.mrb[12].mxu0 %v1519_v26  ;;  %679 = vmatmul.mubr.bf16.gmra.mrb[12].mxu1 %v1540_v27 }
  0x52   : > { %1230 = vmatprep.mubr.msk.bf16.mxu0 %vm505_vm0, %v1523_v28  ;;  %1238 = vmatprep.mubr.msk.bf16.mxu1 %vm505_vm0, %v1544_v29 }
  0x59   : > { %623 = vmatmul.mubr.bf16.gmra.mrb[16].mxu0 %v1525_v30  ;;  %687 = vmatmul.mubr.bf16.gmra.mrb[16].mxu1 %v1546_v31 }
  0x5a   : > { %1231 = vmatprep.mubr.msk.bf16.mxu0 %vm505_vm0, %v1529_v32  ;;  %1239 = vmatprep.mubr.msk.bf16.mxu1 %vm505_vm0, %v1547_v33 }
  0x61   : > { %631 = vmatmul.mubr.bf16.gmra.mrb[20].mxu0 %v1531_v34  ;;  %695 = vmatmul.mubr.bf16.gmra.mrb[20].mxu1 %v1549_v35 }
  0x62   : > { %1232 = vmatprep.mubr.msk.bf16.mxu0 %vm505_vm0, %v1535_v36  ;;  %1240 = vmatprep.mubr.msk.bf16.mxu1 %vm505_vm0, %v1550_v37 }
  0x69   : > { %639 = vmatmul.mubr.bf16.gmra.mrb[24].mxu0 %v1537_v38  ;;  %703 = vmatmul.mubr.bf16.gmra.mrb[24].mxu1 %v1552_v39 }
  0x6a   : > { %1233 = vmatprep.mubr.msk.bf16.mxu0 %vm505_vm0, %v1541_v40  ;;  %1241 = vmatprep.mubr.msk.bf16.mxu1 %vm505_vm0, %v1553_v41 }
  0x71   : > { %647 = vmatmul.mubr.bf16.gmra.mrb[28].mxu0 %v1543_v42  ;;  %711 = vmatmul.mubr.bf16.gmra.mrb[28].mxu1 %v1555_v43 }
 0x10c   : > { %v592_v44 = vpop.f32.mrb[0].mxu0  ;;  %v1875_v45 = vpop.f32.mrb[0].mxu1 }
 0x10d   : > { %v594_v46 = vpop.f32.mrb[1].mxu0  ;;  %v658_v47 = vpop.f32.mrb[1].mxu1  ;;  %v917_v48 = vmul.f32 %v592_v44, %v592_v44 }
 0x10e   : > { %v595_v49 = vpop.f32.mrb[2].mxu0  ;;  %v1877_v50 = vpop.f32.mrb[2].mxu1 }
 0x10f   : > { %v1318_v51 = vpack.c.bf16 %v595_v49, %v592_v44  ;;  %v879_v52 = vadd.f32 %v595_v49, %v592_v44  ;;  %v918_v53 = vmul.f32 %v595_v49, %v595_v49  ;;  %v597_v54 = vpop.f32.mrb[3].mxu0  ;;  %v1358_v55 = vpack.c.bf16 %v1877_v50, %v1875_v45  ;;  %v661_v56 = vpop.f32.mrb[3].mxu1 }
 0x111   : > { %1319 = vst [vmem:[%s1881_s13] sm:$0xff] %v1318_v51   ;;  %v949_v57 = vadd.f32 %v918_v53, %v917_v48  ;;  %1402 = vst [vmem:[%s1881_s13 + $0x40] sm:$0xff] %v1358_v55  }
 0x114   : > { %v600_v58 = vpop.f32.mrb[4].mxu0  ;;  %v1885_v59 = vpop.f32.mrb[4].mxu1 }
 0x115   : > { %v880_v60 = vadd.f32 %v879_v52, %v600_v58  ;;  %v919_v61 = vmul.f32 %v600_v58, %v600_v58  ;;  %v602_v62 = vpop.f32.mrb[5].mxu0  ;;  %v666_v63 = vpop.f32.mrb[5].mxu1 }
 0x116   : > { %v603_v0 = vpop.f32.mrb[6].mxu0  ;;  %v1887_v1 = vpop.f32.mrb[6].mxu1 }
 0x117   : > { %v950_v2 = vadd.f32 %v949_v57, %v919_v61  ;;  %v1323_v3 = vpack.c.bf16 %v603_v0, %v600_v58  ;;  %v881_v4 = vadd.f32 %v880_v60, %v603_v0  ;;  %v920_v5 = vmul.f32 %v603_v0, %v603_v0  ;;  %v605_v6 = vpop.f32.mrb[7].mxu0  ;;  %v669_v7 = vpop.f32.mrb[7].mxu1 }
 0x118   : > { %v1363_v8 = vpack.c.bf16 %v1887_v1, %v1885_v59 }
 0x119   : > { %1395 = vst [vmem:[%s1881_s13 + $0x8] sm:$0xff] %v1323_v3   ;;  %v951_v9 = vadd.f32 %v950_v2, %v920_v5 }
 0x11a   : > { %1403 = vst [vmem:[%s1881_s13 + $0x48] sm:$0xff] %v1363_v8  }
 0x11c   : > { %v608_v10 = vpop.f32.mrb[8].mxu0  ;;  %v1893_v11 = vpop.f32.mrb[8].mxu1 }
 0x11d   : > { %v882_v12 = vadd.f32 %v881_v4, %v608_v10  ;;  %v921_v13 = vmul.f32 %v608_v10, %v608_v10  ;;  %v610_v14 = vpop.f32.mrb[9].mxu0  ;;  %v674_v15 = vpop.f32.mrb[9].mxu1 }
 0x11e   : > { %v611_v16 = vpop.f32.mrb[10].mxu0  ;;  %v1895_v17 = vpop.f32.mrb[10].mxu1 }
 0x11f   : > { %v952_v18 = vadd.f32 %v951_v9, %v921_v13  ;;  %v1328_v19 = vpack.c.bf16 %v611_v16, %v608_v10  ;;  %v883_v20 = vadd.f32 %v882_v12, %v611_v16  ;;  %v922_v21 = vmul.f32 %v611_v16, %v611_v16  ;;  %v613_v22 = vpop.f32.mrb[11].mxu0  ;;  %v677_v23 = vpop.f32.mrb[11].mxu1 }
 0x120   : > { %v1368_v24 = vpack.c.bf16 %v1895_v17, %v1893_v11 }
 0x121   : > { %1396 = vst [vmem:[%s1881_s13 + $0x10] sm:$0xff] %v1328_v19   ;;  %v953_v25 = vadd.f32 %v952_v18, %v922_v21 }
 0x122   : > { %1404 = vst [vmem:[%s1881_s13 + $0x50] sm:$0xff] %v1368_v24  }
 0x124   : > { %v616_v26 = vpop.f32.mrb[12].mxu0  ;;  %v1901_v27 = vpop.f32.mrb[12].mxu1 }
 0x125   : > { %v884_v28 = vadd.f32 %v883_v20, %v616_v26  ;;  %v923_v29 = vmul.f32 %v616_v26, %v616_v26  ;;  %v618_v30 = vpop.f32.mrb[13].mxu0  ;;  %v682_v31 = vpop.f32.mrb[13].mxu1 }
 0x126   : > { %v619_v32 = vpop.f32.mrb[14].mxu0  ;;  %v1903_v33 = vpop.f32.mrb[14].mxu1 }
 0x127   : > { %v954_v34 = vadd.f32 %v953_v25, %v923_v29  ;;  %v1333_v35 = vpack.c.bf16 %v619_v32, %v616_v26  ;;  %v885_v36 = vadd.f32 %v884_v28, %v619_v32  ;;  %v924_v37 = vmul.f32 %v619_v32, %v619_v32  ;;  %v621_v38 = vpop.f32.mrb[15].mxu0  ;;  %v685_v39 = vpop.f32.mrb[15].mxu1 }
 0x128   : > { %v1373_v40 = vpack.c.bf16 %v1903_v33, %v1901_v27 }
 0x129   : > { %1397 = vst [vmem:[%s1881_s13 + $0x18] sm:$0xff] %v1333_v35   ;;  %v955_v41 = vadd.f32 %v954_v34, %v924_v37 }
 0x12a   : > { %1405 = vst [vmem:[%s1881_s13 + $0x58] sm:$0xff] %v1373_v40  }
 0x12c   : > { %v624_v42 = vpop.f32.mrb[16].mxu0  ;;  %v1909_v43 = vpop.f32.mrb[16].mxu1 }
 0x12d   : > { %v886_v44 = vadd.f32 %v885_v36, %v624_v42  ;;  %v925_v46 = vmul.f32 %v624_v42, %v624_v42  ;;  %v626_v47 = vpop.f32.mrb[17].mxu0  ;;  %v690_v48 = vpop.f32.mrb[17].mxu1 }
 0x12e   : > { %v627_v49 = vpop.f32.mrb[18].mxu0  ;;  %v1911_v51 = vpop.f32.mrb[18].mxu1 }
 0x12f   : > { %v956_v52 = vadd.f32 %v955_v41, %v925_v46  ;;  %v1338_v53 = vpack.c.bf16 %v627_v49, %v624_v42  ;;  %v887_v54 = vadd.f32 %v886_v44, %v627_v49  ;;  %v926_v55 = vmul.f32 %v627_v49, %v627_v49  ;;  %v629_v56 = vpop.f32.mrb[19].mxu0  ;;  %v693_v57 = vpop.f32.mrb[19].mxu1 }
 0x130   : > { %v1378_v58 = vpack.c.bf16 %v1911_v51, %v1909_v43  ;;  %v934_v56 = vmul.f32 %v1877_v50, %v1877_v50 }
 0x131   : > { %1398 = vst [vmem:[%s1881_s13 + $0x20] sm:$0xff] %v1338_v53   ;;  %v957_v60 = vadd.f32 %v956_v52, %v926_v55  ;;  %v933_v53 = vmul.f32 %v1875_v45, %v1875_v45 }
 0x132   : > { %1406 = vst [vmem:[%s1881_s13 + $0x60] sm:$0xff] %v1378_v58  }
 0x134   : > { %v632_v61 = vpop.f32.mrb[20].mxu0  ;;  %v1917_v62 = vpop.f32.mrb[20].mxu1 }
 0x135   : > { %v888_v63 = vadd.f32 %v887_v54, %v632_v61  ;;  %v927_v0 = vmul.f32 %v632_v61, %v632_v61  ;;  %v634_v2 = vpop.f32.mrb[21].mxu0  ;;  %v698_v3 = vpop.f32.mrb[21].mxu1 }
 0x136   : > { %v635_v4 = vpop.f32.mrb[22].mxu0  ;;  %v1919_v5 = vpop.f32.mrb[22].mxu1 }
 0x137   : > { %v958_v6 = vadd.f32 %v957_v60, %v927_v0  ;;  %v1343_v7 = vpack.c.bf16 %v635_v4, %v632_v61  ;;  %v889_v8 = vadd.f32 %v888_v63, %v635_v4  ;;  %v928_v9 = vmul.f32 %v635_v4, %v635_v4  ;;  %v637_v10 = vpop.f32.mrb[23].mxu0  ;;  %v701_v12 = vpop.f32.mrb[23].mxu1 }
 0x138   : > { %v1383_v13 = vpack.c.bf16 %v1919_v5, %v1917_v62 }
 0x139   : > { %1399 = vst [vmem:[%s1881_s13 + $0x28] sm:$0xff] %v1343_v7   ;;  %v959_v14 = vadd.f32 %v958_v6, %v928_v9 }
 0x13a   : > { %1407 = vst [vmem:[%s1881_s13 + $0x68] sm:$0xff] %v1383_v13  }
 0x13c   : > { %v640_v15 = vpop.f32.mrb[24].mxu0  ;;  %v1925_v16 = vpop.f32.mrb[24].mxu1 }
 0x13d   : > { %v890_v18 = vadd.f32 %v889_v8, %v640_v15  ;;  %v929_v19 = vmul.f32 %v640_v15, %v640_v15  ;;  %v642_v20 = vpop.f32.mrb[25].mxu0  ;;  %v706_v21 = vpop.f32.mrb[25].mxu1 }
 0x13e   : > { %v643_v22 = vpop.f32.mrb[26].mxu0  ;;  %v1927_v23 = vpop.f32.mrb[26].mxu1 }
 0x13f   : > { %v960_v24 = vadd.f32 %v959_v14, %v929_v19  ;;  %v1348_v25 = vpack.c.bf16 %v643_v22, %v640_v15  ;;  %v891_v26 = vadd.f32 %v890_v18, %v643_v22  ;;  %v930_v28 = vmul.f32 %v643_v22, %v643_v22  ;;  %v645_v29 = vpop.f32.mrb[27].mxu0  ;;  %v709_v30 = vpop.f32.mrb[27].mxu1 }
 0x140   : > { %v1388_v31 = vpack.c.bf16 %v1927_v23, %v1925_v16 }
 0x141   : > { %1400 = vst [vmem:[%s1881_s13 + $0x30] sm:$0xff] %v1348_v25   ;;  %v961_v32 = vadd.f32 %v960_v24, %v930_v28 }
 0x142   : > { %1408 = vst [vmem:[%s1881_s13 + $0x70] sm:$0xff] %v1388_v31  }
 0x144   : > { %v648_v34 = vpop.f32.mrb[28].mxu0  ;;  %v1933_v35 = vpop.f32.mrb[28].mxu1 }
 0x145   : > { %v892_v36 = vadd.f32 %v891_v26, %v648_v34  ;;  %v931_v37 = vmul.f32 %v648_v34, %v648_v34  ;;  %v650_v38 = vpop.f32.mrb[29].mxu0  ;;  %v714_v39 = vpop.f32.mrb[29].mxu1 }
 0x146   : > { %v651_v40 = vpop.f32.mrb[30].mxu0  ;;  %v1937_v41 = vpop.f32.mrb[30].mxu1 }
 0x147   : > { %v962_v42 = vadd.f32 %v961_v32, %v931_v37  ;;  %v1353_v44 = vpack.c.bf16 %v651_v40, %v648_v34  ;;  %v893_v46 = vadd.f32 %v892_v36, %v651_v40  ;;  %v932_v47 = vmul.f32 %v651_v40, %v651_v40  ;;  %v653_v48 = vpop.f32.mrb[31].mxu0  ;;  %v717_v49 = vpop.f32.mrb[31].mxu1 }
 0x148   : > { %v1393_v52 = vpack.c.bf16 %v1937_v41, %v1933_v35 }
 0x149   : > { %1401 = vst [vmem:[%s1881_s13 + $0x38] sm:$0xff] %v1353_v44   ;;  %v894_v54 = vadd.f32 %v893_v46, %v1875_v45  ;;  %v963_v55 = vadd.f32 %v962_v42, %v932_v47 }
 0x14a   : > { %1409 = vst [vmem:[%s1881_s13 + $0x78] sm:$0xff] %v1393_v52  }
 0x14b   : > { %v895_v57 = vadd.f32 %v894_v54, %v1877_v50  ;;  %v964_v58 = vadd.f32 %v963_v55, %v933_v53 }
 0x14c   : > { %1569 = shalt.err (!%p1566_p5)
}
 0x14d   : > { %s1570_s14 = scalar_lea.hbm %s1942_s7, 2048  ;;  %s1574_s29 = scalar_lea.hbm %s2120_s2, 4096 }
 0x14e   : > { %p1571_p6 = scmp.ne.s32.totalorder %s1942_s7, %s1570_s14  ;;  %p1575_p10 = scmp.lt.u32.totalorder %s1942_s7, %s2120_s2 }
 0x14f   : > { %p1576_p11 = scmp.lt.u32.totalorder %s1574_s29, %s1570_s14  ;;  %p1578_p13 = scmp.lt.u32.totalorder %s1570_s14, %s1942_s7 }
 0x150   : > { %p1572_p7 = pnand %p1571_p6, %p1769_p4 }
 0x151   : > { %p1577_p12 = por %p1576_p11, %p1575_p10 }
 0x152   : > { %p1573_p9 = pneg %p1572_p7 }
 0x153   : > { %p1579_p0 = por %p1578_p13, %p1577_p12 }
 0x155   : > { %p1580_p1 = pnand %p1579_p0, %p1573_p9 }
 0x157   : > { %1583 = shalt.err (!%p1580_p1)
}
 0x158   : > { %s1698_s9 = smov 64   ;;  %s1699_s10 = smov 4   ;;  %v935_v45 = vmul.f32 %v1885_v59, %v1885_v59  ;;  %v896_v50 = vadd.f32 %v895_v57, %v1885_v59  ;;  %v965_v60 = vadd.f32 %v964_v58, %v934_v56  ;;  %v936_v61 = vmul.f32 %v1887_v1, %v1887_v1 }
 0x159   : > { %1430 = dma.vmem_to_hbm [thread:$0]  (%p1769_p4), %s1944_s30, 2048, %s1942_s7, %s988_s8, %s1698_s9, %s1698_s9, %s1699_s10   ;;  %v937_v2 = vmul.f32 %v1893_v11, %v1893_v11  ;;  %v938_v6 = vmul.f32 %v1895_v17, %v1895_v17  ;;  %v939_v59 = vmul.f32 %v1901_v27, %v1901_v27  ;;  %v941_v14 = vmul.f32 %v1909_v43, %v1909_v43 }
 0x15a   : > { %v897_v63 = vadd.f32 %v896_v50, %v1887_v1  ;;  %v966_v0 = vadd.f32 %v965_v60, %v935_v45  ;;  %v940_v1 = vmul.f32 %v1903_v33, %v1903_v33  ;;  %v942_v19 = vmul.f32 %v1911_v51, %v1911_v51  ;;  %s2024_s30 = sand.u32 1, %s1176_s21   ;;  %s1277_s7 = sshll.u32 %s1686_s18, 4 }
 0x15b   : > { %v943_v21 = vmul.f32 %v1917_v62, %v1917_v62  ;;  %v944_v24 = vmul.f32 %v1919_v5, %v1919_v5  ;;  %v945_v26 = vmul.f32 %v1925_v16, %v1925_v16  ;;  %v946_v29 = vmul.f32 %v1927_v23, %v1927_v23  ;;  %s231_s8 = scalar_lea.vmem [#allocation4], %s1872_s24  ;;  %s237_s12 = scalar_lea.vmem [#allocation6], %s1872_s24 }
 0x15c   : > { %v967_v3 = vadd.f32 %v966_v0, %v936_v61  ;;  %v898_v4 = vadd.f32 %v897_v63, %v1893_v11  ;;  %s1028_s11 = sshll.u32 %s231_s8, 4  ;;  %s1042_s14 = sshll.u32 %s237_s12, 4  ;;  %s2036_s11 = int_to_ptr.vmem [resolvable:$true] %s1028_s11  ;;  %s2043_s14 = int_to_ptr.vmem [resolvable:$true] %s1042_s14 }
 0x15d   : > { %s2034_s29 = scalar_lea.hbm %s2121_s3, %s1277_s7  ;;  %s2041_s5 = scalar_lea.hbm %s2122_s4, %s1277_s7 }
 0x15e   : > { %v899_v7 = vadd.f32 %v898_v4, %v1895_v17  ;;  %v968_v8 = vadd.f32 %v967_v3, %v937_v2  ;;  %s993_s6 = scalar_lea.sflag [#allocation5], %s2024_s30  ;;  %s1584_s9 = scalar_lea.vmem %s2036_s11, 16 }
 0x15f   : > { %p1585_p2 = scmp.ne.s32.totalorder %s2036_s11, %s1584_s9  ;;  %s1700_s10 = smov [#allocation4]  }
 0x160   : > { %v900_v9 = vadd.f32 %v899_v7, %v1901_v27  ;;  %v969_v10 = vadd.f32 %v968_v8, %v938_v6  ;;  %s1588_s26 = sshll.u32 %s1700_s10, 4  ;;  %s1589_s26 = int_to_ptr.vmem [resolvable:$false] %s1588_s26 }
 0x161   : > { %p1586_p3 = pnand %p1585_p2, %p1769_p4  ;;  %s1590_s13 = scalar_lea.vmem %s1589_s26, 32 }
 0x162   : > { %v901_v12 = vadd.f32 %v900_v9, %v1903_v33  ;;  %v970_v13 = vadd.f32 %v969_v10, %v939_v59  ;;  %p1591_p6 = scmp.lt.s32.totalorder %s2036_s11, %s1589_s26  ;;  %p1592_p7 = scmp.lt.s32.totalorder %s1590_s13, %s1584_s9 }
 0x163   : > { %p1587_p5 = pneg %p1586_p3 }
 0x164   : > { %v902_v11 = vadd.f32 %v901_v12, %v1909_v43  ;;  %v971_v15 = vadd.f32 %v970_v13, %v940_v1  ;;  %p1593_p9 = por %p1592_p7, %p1591_p6 }
 0x166   : > { %v972_v17 = vadd.f32 %v971_v15, %v941_v14  ;;  %v903_v18 = vadd.f32 %v902_v11, %v1911_v51  ;;  %p1594_p10 = pnand %p1593_p9, %p1587_p5 }
 0x168   : > { %v973_v27 = vadd.f32 %v972_v17, %v942_v19  ;;  %v904_v20 = vadd.f32 %v903_v18, %v1917_v62  ;;  %v947_v62 = vmul.f32 %v1933_v35, %v1933_v35 }
 0x16a   : > { %v974_v33 = vadd.f32 %v973_v27, %v943_v21  ;;  %v905_v22 = vadd.f32 %v904_v20, %v1919_v5 }
 0x16c   : > { %v975_v43 = vadd.f32 %v974_v33, %v944_v24  ;;  %v906_v25 = vadd.f32 %v905_v22, %v1925_v16  ;;  %v948_v16 = vmul.f32 %v1937_v41, %v1937_v41 }
 0x16e   : > { %v976_v28 = vadd.f32 %v975_v43, %v945_v26  ;;  %v907_v51 = vadd.f32 %v906_v25, %v1927_v23 }
 0x170   : > { %v977_v30 = vadd.f32 %v976_v28, %v946_v29  ;;  %v908_v5 = vadd.f32 %v907_v51, %v1933_v35 }
 0x172   : > { %v978_v31 = vadd.f32 %v977_v30, %v947_v62  ;;  %v909_v32 = vadd.f32 %v908_v5, %v1937_v41 }
 0x174   : > { %v910_v34 = vrot.slane %v909_v32, 4  ;;  %v979_v36 = vadd.f32 %v978_v31, %v948_v16 }
 0x176   : > { %v911_v37 = vadd.f32 %v910_v34, %v909_v32  ;;  %v980_v23 = vrot.slane %v979_v36, 4 }
 0x178   : > { %v912_v38 = vrot.slane %v911_v37, 2  ;;  %v981_v39 = vadd.f32 %v980_v23, %v979_v36 }
 0x17a   : > { %v982_v40 = vrot.slane %v981_v39, 2  ;;  %v913_v42 = vadd.f32 %v912_v38, %v911_v37 }
 0x17c   : > { %v983_v35 = vadd.f32 %v982_v40, %v981_v39  ;;  %v914_v44 = vrot.slane %v913_v42, 1 }
 0x17e   : > { %v915_v41 = vadd.f32 %v914_v44, %v913_v42  ;;  %v984_v46 = vrot.slane %v983_v35, 1 }
 0x180   : > { %916 = vst [vmem:[%s231_s8] sm:$0x1] %v915_v41  ;;  %v985_v47 = vadd.f32 %v984_v46, %v983_v35 }
 0x181   : > { %1597 = shalt.err (!%p1594_p10)
}
 0x182   : > { %s1598_s7 = scalar_lea.hbm %s2034_s29, 16  ;;  %s1602_s21 = scalar_lea.hbm %s2121_s3, 32 }
 0x183   : > { %p1599_p11 = scmp.ne.s32.totalorder %s2034_s29, %s1598_s7  ;;  %p1603_p0 = scmp.lt.u32.totalorder %s2034_s29, %s2121_s3 }
 0x184   : > { %p1604_p1 = scmp.lt.u32.totalorder %s1602_s21, %s1598_s7  ;;  %p1606_p3 = scmp.lt.u32.totalorder %s1598_s7, %s2034_s29 }
 0x185   : > { %p1600_p12 = pnand %p1599_p11, %p1769_p4 }
 0x186   : > { %p1605_p2 = por %p1604_p1, %p1603_p0 }
 0x187   : > { %p1601_p13 = pneg %p1600_p12 }
 0x188   : > { %p1607_p5 = por %p1606_p3, %p1605_p2 }
 0x18a   : > { %p1608_p6 = pnand %p1607_p5, %p1601_p13 }
 0x18c   : > { %1611 = shalt.err (!%p1608_p6)
}
 0x18d   : > { %1431 = dma.vmem_to_hbm [thread:$0]  (%p1769_p4), %s2036_s11, 16, %s2034_s29, %s993_s6   ;;  %986 = vst [vmem:[%s237_s12] sm:$0x1] %v985_v47 }
 0x18e   : > { %s1612_s9 = scalar_lea.vmem %s2043_s14, 16  ;;  %s1701_s13 = smov [#allocation6]  }
 0x18f   : > { %p1613_p7 = scmp.ne.s32.totalorder %s2043_s14, %s1612_s9  ;;  %s1616_s7 = sshll.u32 %s1701_s13, 4  ;;  %s1617_s7 = int_to_ptr.vmem [resolvable:$false] %s1616_s7 }
 0x190   : > { %s1618_s8 = scalar_lea.vmem %s1617_s7, 32  ;;  %p1619_p11 = scmp.lt.s32.totalorder %s2043_s14, %s1617_s7 }
 0x191   : > { %p1614_p9 = pnand %p1613_p7, %p1769_p4  ;;  %p1620_p12 = scmp.lt.s32.totalorder %s1618_s8, %s1612_s9 }
 0x193   : > { %p1615_p10 = pneg %p1614_p9  ;;  %p1621_p13 = por %p1620_p12, %p1619_p11 }
 0x195   : > { %p1622_p0 = pnand %p1621_p13, %p1615_p10 }
 0x197   : > { %1625 = shalt.err (!%p1622_p0)
}
 0x198   : > { %s1626_s24 = scalar_lea.hbm %s2041_s5, 16  ;;  %s1630_s29 = scalar_lea.hbm %s2122_s4, 32 }
 0x199   : > { %p1627_p1 = scmp.ne.s32.totalorder %s2041_s5, %s1626_s24  ;;  %p1631_p5 = scmp.lt.u32.totalorder %s2041_s5, %s2122_s4 }
 0x19a   : > { %p1632_p6 = scmp.lt.u32.totalorder %s1630_s29, %s1626_s24  ;;  %p1634_p9 = scmp.lt.u32.totalorder %s1626_s24, %s2041_s5 }
 0x19b   : > { %p1628_p2 = pnand %p1627_p1, %p1769_p4 }
 0x19c   : > { %p1633_p7 = por %p1632_p6, %p1631_p5 }
 0x19d   : > { %p1629_p3 = pneg %p1628_p2 }
 0x19e   : > { %p1635_p10 = por %p1634_p9, %p1633_p7 }
 0x1a0   : > { %p1636_p11 = pnand %p1635_p10, %p1629_p3 }
 0x1a2   : > { %1639 = shalt.err (!%p1636_p11)
}
 0x1a3   : > { %1432 = dma.vmem_to_hbm [thread:$0]  (%p1769_p4), %s2043_s14, 16, %s2041_s5, %s993_s6  }
 0x1a4 PF: > { %p1446_p12 = scmp.ge.s32.totalorder %s1694_s20, 2  ;;  %s1054_s10 = sand.u32 1, %s1674_s15  }
 0x1a5   : > { %s1055_s26 = scalar_lea.sflag [#allocation3], %s1054_s10 }
 0x1a6   : > { %p1437_p13 = pnand %p1446_p12, %p1778_p8 }
 0x1a8   : > { %1665 = dma.done.wait (!%p1437_p13), %s1055_s26, 2048  }
 0x1a9   : > { %1667 = vsyncadd (!%p1437_p13), %s1055_s26, 4294965248  ;;  %s1063_s9 = sand.u32 1, %s1177_s22  }
 0x1aa   : > { %s1064_s25 = scalar_lea.sflag [#allocation5], %s1063_s9 }
 0x1ab   : > { %1669 = dma.done.wait (!%p1437_p13), %s1064_s25, 32  }
 0x1ac   : > { %1671 = vsyncadd (!%p1437_p13), %s1064_s25, 4294967264  ;;  %s21_s20 = sadd.s32 1, %s1694_s20   ;;  %s2125_s15 = smov %s1678_s16 }
 0x1ad   : > { %p18_p4 = scmp.ge.s32.totalorder %s21_s20, 4   ;;  %s2126_s16 = smov %s1682_s17 }
 0x1ae   : > { %s2127_s17 = smov %s1784_s28  ;;  %s2128_s18 = smov %s1690_s19 }
 0x1af   : > { %s2129_s19 = smov %s2131_s23  ;;  %20 = sbr.rel (!%p18_p4) target bundleno = 6 (0x6), region = 95 }
 0x1b6   :  { %1076 = vsyncpa [#allocation3], 1 }
 0x1b7   :  { %1078 = vsyncpa [#allocation3 + $0x1], 1 }
 0x1b8   :  { %1079 = vsyncpa [#allocation5], 1 }
 0x1b9   :  { %1081 = vsyncpa [#allocation5 + $0x1], 1 }

</bundles_post_ra>
